<compile_context>
chip_gen: v7x
topology: tpu7x:2x2x1
jax: 0.10.0
libtpu: 0.0.40
codegen_flags: <defaults>
</compile_context>

<pallas_src>
import functools

import jax
import jax.numpy as jnp
from jax.experimental import pallas as pl
from jax.experimental.pallas import tpu as pltpu

# Model dims from FullyConnectedModel(InputDim=10, OutputDim=1)
DIMS = [10, 128, 128, 64, 16, 1]
IN_DIM = DIMS[0]


def _cdiv(a, b):
    return -(-a // b)


def _round_up(n, m):
    return ((n + m - 1) // m) * m


def _tpu_defaults():
    """(default batch tile, #TensorCores fed by a 'parallel' grid axis)."""
    kind = ""
    try:
        kind = jax.devices()[0].device_kind.lower()
    except Exception:
        pass
    if "7" in kind:                      # v7x: 2 TCs/chip, ~3.2 TB/s per TC
        return 4096, 2
    if "v6" in kind or "6e" in kind:     # v6e: 1 TC, ~1.4 TB/s
        return 2048, 1
    if "v4" in kind or "v5p" in kind:    # megacore chips: 2 TCs per device
        return 2048, 2
    return 2048, 1                       # v5e & fallback (~0.8 TB/s)


def _choose_block_m(batch, block_m, num_cores):
    """Pick (rows per grid step, number of grid steps).

    When the whole batch fits in one tile we use a block equal to the full
    array dims (always legal, no padding, single DMA).  Multi-tile grids use a
    multiple-of-128 tile so every output store is a full lane-dense slab; on
    multi-TC chips the tile is capped so each core gets at least one step.
    """
    batch = max(int(batch), 1)
    block_m = max(_round_up(int(block_m), 128), 128)
    if num_cores >= 2 and batch >= 2 * 128:
        per_core = _round_up(_cdiv(batch, num_cores), 128)
        block_m = max(min(block_m, per_core), 128)
    if batch <= block_m:
        return batch, 1                          # single full-array tile
    return block_m, _cdiv(batch, block_m)


def _affine_rows_kernel(x_ref, w_ref, b_ref, o_ref):
    # x_ref: (bm, 10) batch-major tile;  w_ref: (1, 10);  b_ref: (1, 1) f32
    # o_ref: (1, bm) lane-dense output slab.
    # y[0, j] = sum_k w[0, k] * x[j, k]  (QK^T-style contract-last-dims) gives
    # the result directly in lane-dense (1, bm) form -> unmasked full stores.
    y = jax.lax.dot_general(
        w_ref[...], x_ref[...],
        (((1,), (1,)), ((), ())),
        preferred_element_type=jnp.float32,
    )
    o_ref[...] = (y + b_ref[...]).astype(o_ref.dtype)


def _affine_cols_kernel(xt_ref, w_ref, b_ref, o_ref):
    # xt_ref: (10, bm) features-major tile (no 10 -> 128 lane padding in HBM).
    y = jax.lax.dot_general(
        w_ref[...], xt_ref[...],
        (((1,), (0,)), ((), ())),
        preferred_element_type=jnp.float32,
    )
    o_ref[...] = (y + b_ref[...]).astype(o_ref.dtype)


def _launch(kernel, x, w_row, b_eff, bm, nb, x_block, x_index_map, out_dtype):
    """One pallas_call: stream x through a single folded affine map."""
    b_out = bm * nb                      # output lane-padded to grid coverage
    x_spec = None
    if nb > 2:
        # Extra in-flight DMA buffers; the body has ~zero compute to hide
        # DMA behind, so deeper buffering keeps back-to-back copies queued.
        try:
            x_spec = pl.BlockSpec(x_block, x_index_map,
                                  pipeline_mode=pl.Buffered(3))
        except (TypeError, AttributeError):
            x_spec = None
    if x_spec is None:
        x_spec = pl.BlockSpec(x_block, x_index_map)

    return pl.pallas_call(
        kernel,
        out_shape=jax.ShapeDtypeStruct((1, b_out), out_dtype),
        grid_spec=pltpu.PrefetchScalarGridSpec(
            num_scalar_prefetch=0,
            grid=(nb,),
            in_specs=[
                x_spec,
                pl.BlockSpec((1, IN_DIM), lambda i: (0, 0)),   # folded weight
                pl.BlockSpec((1, 1), lambda i: (0, 0)),        # folded bias
            ],
            # Output never has edge blocks: (1, bm) tiles an array of width
            # nb * bm exactly; the extra (garbage) columns are sliced off.
            out_specs=pl.BlockSpec((1, bm), lambda i: (0, i)),
        ),
        compiler_params=pltpu.CompilerParams(
            dimension_semantics=("parallel",)),
    )(x, w_row, b_eff)


def fold_affine_chain(params):
    """Fold the activation-free Linear chain ONCE per parameter set (outside
    the hot path).  params: list of (W_t, b) with W_t: (in, out), b: (1, out).
    Returns (w_row: (1, 10), b_eff: (1, 1)), both float32.
    NOTE: only valid because the Sequential has no nonlinearities."""
    w_eff, b_eff = params[0]
    for (w_t, b) in params[1:]:
        b_eff = b_eff @ w_t + b
        w_eff = w_eff @ w_t
    return jnp.asarray(w_eff.T, jnp.float32), jnp.asarray(b_eff, jnp.float32)


@functools.partial(jax.jit, static_argnames=("block_m",))
def mlp_forward(x, w_row, b_eff, block_m=None):
    """x: (B, 10) batch-major (f32 or bf16).  Returns (B, 1) in x.dtype."""
    B, f = x.shape
    assert f == IN_DIM
    default_bm, ncores = _tpu_defaults()
    bm, nb = _choose_block_m(B, block_m if block_m is not None else default_bm,
                             ncores)
    w = w_row.astype(x.dtype)            # tiny (1,10); dot still accums in f32
    out = _launch(_affine_rows_kernel, x, w, b_eff, bm, nb,
                  (bm, IN_DIM), lambda i: (i, 0), x.dtype)
    return out[0, :B].reshape(B, 1)


@functools.partial(jax.jit, static_argnames=("block_m",))
def mlp_forward_features_major(x_t, w_row, b_eff, block_m=None):
    """x_t: (10, B) features-major input (use when the producer can emit this
    layout directly -- avoids the (B,10) lane padding).  Returns (B, 1)."""
    f, B = x_t.shape
    assert f == IN_DIM
    default_bm, ncores = _tpu_defaults()
    bm, nb = _choose_block_m(B, block_m if block_m is not None else default_bm,
                             ncores)
    w = w_row.astype(x_t.dtype)
    out = _launch(_affine_cols_kernel, x_t, w, b_eff, bm, nb,
                  (IN_DIM, bm), lambda i: (0, i), x_t.dtype)
    return out[0, :B].reshape(B, 1)


def init_params(key):
    """Deterministic init mimicking PyTorch nn.Linear default:
    U(-1/sqrt(fan_in), 1/sqrt(fan_in)) for both weight and bias.
    Weights returned pre-transposed to (in, out); biases as (1, out)."""
    params = []
    for li in range(len(DIMS) - 1):
        fan_in, fan_out = DIMS[li], DIMS[li + 1]
        key, kw, kb = jax.random.split(key, 3)
        bound = 1.0 / jnp.sqrt(fan_in)
        w = jax.random.uniform(kw, (fan_out, fan_in), jnp.float32, -bound, bound)
        b = jax.random.uniform(kb, (fan_out,), jnp.float32, -bound, bound)
        params.append((jnp.transpose(w), b.reshape(1, fan_out)))
    return params


def reference_forward(x, params):
    """Layer-by-layer reference matching the PyTorch Sequential exactly."""
    h = x
    for (w_t, b) in params:
        h = h @ w_t + b
    return h


if __name__ == "__main__":
    key = jax.random.PRNGKey(0)
    kx, kp = jax.random.split(key)
    params = init_params(kp)

    # Fold once per parameter set (hoisted out of the per-call path).
    w_row, b_eff = fold_affine_chain(params)

    # Batches exercising: block == full array (no divisibility constraints),
    # a mid-size single-tile path, and a multi-step grid with a partial edge
    # tile + Buffered(3) (block_m=256 override forces >2 grid steps).
    for batch, blk in ((4, None), (200, None), (1000, 256)):
        x = jax.random.normal(jax.random.fold_in(kx, batch),
                              (batch, IN_DIM), jnp.float32)
        y = mlp_forward(x, w_row, b_eff, block_m=blk)
        # Features-major path (transpose here is test-only; in production the
        # producer would emit (10, B) directly).
        y_t = mlp_forward_features_major(x.T, w_row, b_eff, block_m=blk)
        jax.block_until_ready((y, y_t))

        y_ref = reference_forward(x, params)
        assert y.shape == (batch, 1), y.shape
        err = float(jnp.max(jnp.abs(y - y_ref)))
        err_t = float(jnp.max(jnp.abs(y_t - y_ref)))
        assert jnp.allclose(y, y_ref, atol=1e-4, rtol=1e-4), err
        assert jnp.allclose(y_t, y_ref, atol=1e-4, rtol=1e-4), err_t

    print("KERNEL_OK")
</pallas_src>

<mosaic_0001>
module attributes {stable_mosaic.version = 11 : i64} {
  func.func @_affine_rows_kernel(%arg0: i32, %arg1: memref<4x10xf32, #tpu.memory_space<vmem>>, %arg2: memref<1x10xf32, #tpu.memory_space<vmem>>, %arg3: memref<1x1xf32, #tpu.memory_space<vmem>>, %arg4: memref<1x4xf32, #tpu.memory_space<vmem>>) attributes {dimension_semantics = [#tpu.dimension_semantics<parallel>], iteration_bounds = array<i64: 1>, scalar_prefetch = 0 : i64, scratch_operands = 0 : i64, tpu.core_type = #tpu.core_type<tc>, window_params = [{transform_indices = @transform_0, window_bounds = array<i64: 4, 10>}, {pipeline_mode = #tpu.pipeline_mode<synchronous>, transform_indices = @transform_1, window_bounds = array<i64: 1, 10>}, {pipeline_mode = #tpu.pipeline_mode<synchronous>, transform_indices = @transform_2, window_bounds = array<i64: 1, 1>}, {transform_indices = @transform_3, window_bounds = array<i64: 1, 4>}]} {
    %c0 = arith.constant 0 : index
    %c0_0 = arith.constant 0 : index
    %0 = vector.load %arg2[%c0, %c0_0] : memref<1x10xf32, #tpu.memory_space<vmem>>, vector<1x10xf32>
    %c0_1 = arith.constant 0 : index
    %c0_2 = arith.constant 0 : index
    %1 = vector.load %arg1[%c0_1, %c0_2] : memref<4x10xf32, #tpu.memory_space<vmem>>, vector<4x10xf32>
    %cst = arith.constant dense<0.000000e+00> : vector<1x4xf32>
    %2 = tpu.matmul %0, %1, %cst {dimension_numbers = #tpu.dot_dimension_numbers<[1], [1], [0], [0], [0, 0, 1, 0], [], []>} : vector<1x10xf32>, vector<4x10xf32>, vector<1x4xf32> -> vector<1x4xf32>
    %c0_3 = arith.constant 0 : index
    %c0_4 = arith.constant 0 : index
    %3 = vector.load %arg3[%c0_3, %c0_4] : memref<1x1xf32, #tpu.memory_space<vmem>>, vector<1x1xf32>
    %4 = vector.broadcast %3 : vector<1x1xf32> to vector<1x4xf32>
    %5 = arith.addf %2, %4 : vector<1x4xf32>
    %c0_5 = arith.constant 0 : index
    %c0_6 = arith.constant 0 : index
    %6 = vector.load %arg4[%c0_5, %c0_6] : memref<1x4xf32, #tpu.memory_space<vmem>>, vector<1x4xf32>
    tpu.vector_store %arg4[%c0_5, %c0_6], %5 {strides = array<i32>} : memref<1x4xf32, #tpu.memory_space<vmem>>, vector<1x4xf32>,
    return
  }
  func.func @transform_0(%arg0: i32) -> (i32, i32) {
    %c0_i32 = arith.constant 0 : i32
    %c0_i32_0 = arith.constant 0 : i32
    return %arg0, %c0_i32 : i32, i32
  }
  func.func @transform_1(%arg0: i32) -> (i32, i32) {
    %c0_i32 = arith.constant 0 : i32
    %c0_i32_0 = arith.constant 0 : i32
    %c0_i32_1 = arith.constant 0 : i32
    return %c0_i32, %c0_i32_0 : i32, i32
  }
  func.func @transform_2(%arg0: i32) -> (i32, i32) {
    %c0_i32 = arith.constant 0 : i32
    %c0_i32_0 = arith.constant 0 : i32
    %c0_i32_1 = arith.constant 0 : i32
    return %c0_i32, %c0_i32_0 : i32, i32
  }
  func.func @transform_3(%arg0: i32) -> (i32, i32) {
    %c0_i32 = arith.constant 0 : i32
    %c0_i32_0 = arith.constant 0 : i32
    return %c0_i32, %arg0 : i32, i32
  }
}

</mosaic_0001>

<bundles_post_ra>
// kernel: mlp_forward.1
= control target key start
LH: loop header
LB: loop body
LE: loop exit
PB: predicated region body
PF: predicated region fallthrough
CT: control target
= control target key end

     0   :  { %s253_s0 = inlined_call_operand.hbm [shape: f32[4,10], index: 0, kind: input, shape index: {}]   ;;  %s254_s1 = inlined_call_operand.vmem [shape: f32[1,10], index: 1, kind: input, shape index: {}]   ;;  %s255_s2 = inlined_call_operand.<no memory space> [shape: f32[1,1], index: 2, kind: input, shape index: {}]   ;;  %s256_s3 = inlined_call_operand.hbm [shape: f32[1,4], index: 3, kind: output, shape index: {}]  }
   0x1   :  { %v8_v0 = vstv %s255_s2 }
   0x2   :  { %9 = vst [vmem:[#allocation2] sm:$0x1] %v8_v0 }
   0x3   :  { %10 = vsyncpa [#allocation4], 0 }
   0x4   :  { %11 = vsyncpa [#allocation5], 0  ;;  %s198_s14 = smov [#allocation3]   ;;  %s150_s18 = scalar_lea.hbm %s253_s0, 64 }
   0x5   :  { %s18_s15 = sshll.u32 %s198_s14, 4  ;;  %p151_p0 = scmp.ne.s32.totalorder %s253_s0, %s150_s18  ;;  %s19_s15 = int_to_ptr.vmem [resolvable:$true] %s18_s15 }
   0x6   :  { %p154_p1 = scmp.lt.u32.totalorder %s150_s18, %s253_s0 }
   0x8   :  { %p156_p2 = pnand %p154_p1, %p151_p0 }
   0xa   :  { %159 = shalt.err (!%p156_p2)
}
   0xb   :  { %s160_s2 = scalar_lea.vmem %s19_s15, 64  ;;  %p165_p4 = scmp.lt.s32.totalorder %s19_s15, %s19_s15 }
   0xc   :  { %p161_p3 = scmp.ne.s32.totalorder %s19_s15, %s160_s2  ;;  %p166_p5 = scmp.lt.s32.totalorder %s160_s2, %s160_s2 }
   0xe   :  { %p167_p6 = por %p166_p5, %p165_p4 }
  0x10   :  { %p168_p7 = pnand %p167_p6, %p161_p3 }
  0x12   :  { %171 = shalt.err (!%p168_p7)
}
  0x13   :  { %21 = dma.hbm_to_vmem [thread:$0]  %s253_s0, 64, %s19_s15, [#allocation4]  }
  0x14   :  { %194 = dma.done.wait [#allocation4], 64  }
  0x15   :  { %195 = vsyncadd [#allocation4], 4294967232  ;;  %v199_v1 = vmov 0.0   ;;  %vm200_vm0 = vmmov 0   ;;  %v201_v2 = vmov 0   ;;  %vm41_vm1 = vcmask 80896  }
  0x16   :  { %139 = vmatprep.subr.mxu0 %v199_v1  ;;  %141 = vmatprep.mubr.msk.f32.mxu0 %vm200_vm0, %v199_v1  ;;  %v30_v3 = vld [vmem:[#allocation3] sm:$0xf]  ;;  %v31_v4 = vld [vmem:[#allocation2] sm:$0x1]  ;;  %v37_v6 = vlaneseq  ;;  %s202_s0 = smov [#allocation6]   ;;  %vm118_vm2 = vcmask 24576  }
  0x17   :  { %149 = vset.pattern.permute.xlu0 %v201_v2  ;;  %140 = vmatpush3.xpose.msk.msra.mxu0 %vm41_vm1, %v30_v3  ;;  %v29_v5 = vld [vmem:[%s254_s1] sm:$0x1]  ;;  %s126_s27 = sshll.u32 %s202_s0, 4  ;;  %s127_s27 = int_to_ptr.vmem [resolvable:$true] %s126_s27 }
  0x18   :  { %34 = vperm.xlu0 %149, %v31_v4   ;;  %v38_v7 = vshrl.u32 %v37_v6, 7  ;;  %s172_s28 = scalar_lea.vmem %s127_s27, 16  ;;  %s176_s29 = scalar_lea.vmem %s127_s27, 32 }
  0x19   :  { %p173_p8 = scmp.ne.s32.totalorder %s127_s27, %s172_s28  ;;  %p177_p9 = scmp.lt.s32.totalorder %s127_s27, %s127_s27 }
  0x1a   :  { %142 = vmatmul.mubr.msk.f32.vlgmr.msra.gmra.mrb[0].mxu0 %vm41_vm1, %v29_v5  ;;  %v39_v8 = vsub.s32 0, %v38_v7  ;;  %p178_p10 = scmp.lt.s32.totalorder %s176_s29, %s172_s28 }
  0x1c   :  { %p179_p11 = por %p178_p10, %p177_p9 }
  0x1e   :  { %p180_p12 = pnand %p179_p11, %p173_p8 }
  0x97   :  { %v35_v9 = vpop.permute.xlu0 %34 }
  0x98   :  { %v40_v10 = vrot.slane %v35_v9, %v39_v8 }
  0xed   :  { %v114_v11 = vpop.f32.mrb[0].mxu0 }
  0xee   :  { %v115_v12 = vadd.f32 %v114_v11, %v40_v10  ;;  %v143_v13 = vpop.f32.mrb[1].mxu0 }
  0xf0   :  { %119 = vst.msk [vmem:[#allocation6] sm:$0x1] %vm118_vm2, %v115_v12 }
  0xf1   :  { %183 = shalt.err (!%p180_p12)
}
  0xf2   :  { %s184_s4 = scalar_lea.hbm %s256_s3, 16 }
  0xf3   :  { %p185_p13 = scmp.ne.s32.totalorder %s256_s3, %s184_s4  ;;  %p188_p0 = scmp.lt.u32.totalorder %s184_s4, %s256_s3 }
  0xf5   :  { %p190_p1 = pnand %p188_p0, %p185_p13 }
  0xf7   :  { %193 = shalt.err (!%p190_p1)
}
  0xf8   :  { %129 = dma.vmem_to_hbm [thread:$0]  %s127_s27, 16, %s256_s3, [#allocation5]  }
  0xf9   :  { %196 = dma.done.wait [#allocation5], 16  }
  0xfa   :  { %197 = vsyncadd [#allocation5], 4294967280 }
  0xfb   :  { %133 = vsyncpa [#allocation4], 1 }
  0xfc   :  { %134 = vsyncpa [#allocation5], 1 }

</bundles_post_ra>
